<compile_context>
chip_gen: v7x
topology: tpu7x:2x2x1
jax: 0.10.0
libtpu: 0.0.40
codegen_flags: <defaults>
</compile_context>

<pallas_src>
import functools

import jax
import jax.numpy as jnp
from jax import lax
from jax.experimental import pallas as pl
from jax.experimental.pallas import tpu as pltpu


# ----------------------------------------------------------------------------
# Shared in-kernel helpers
# ----------------------------------------------------------------------------
def _conv1x1(w, x, use_vpu):
    """1x1 conv: w (Co, Ci) f32, x (Nb, Ci, P) f32 -> (Nb, Co, P) f32."""
    co, ci = w.shape
    if use_vpu:
        # Small-C path: Ci broadcast-FMAs on the VPU (outer products), no MXU involvement.
        out = w[:, 0:1][None, :, :] * x[:, 0:1, :]
        for c in range(1, ci):
            out = out + w[:, c:c + 1][None, :, :] * x[:, c:c + 1, :]
        return out
    # Large-C path: bf16 operands, f32 accumulate on the MXU.
    return jnp.einsum(
        "oc,bcp->bop",
        w.astype(jnp.bfloat16),
        x.astype(jnp.bfloat16),
        preferred_element_type=jnp.float32,
    )


# ----------------------------------------------------------------------------
# Kernel 1: 1x1 conv + folded BN + ReLU6 (the ConvLayer on the "up" path)
# ----------------------------------------------------------------------------
def _convbn_relu6_kernel(x_ref, w_ref, b_ref, o_ref, *, use_vpu):
    x = x_ref[...].astype(jnp.float32)          # (Nb, Ci, P)
    w = w_ref[...].astype(jnp.float32)          # (Co, Ci)
    b = b_ref[...].astype(jnp.float32)          # (Co, 1)
    y = _conv1x1(w, x, use_vpu) + b[None, :, :]
    o_ref[...] = jnp.clip(y, 0.0, 6.0).astype(o_ref.dtype)


# ----------------------------------------------------------------------------
# Kernel 2: conv_side(+BN+ReLU6) fused with relu(up+side) and the CRP block
# ----------------------------------------------------------------------------
def _fuse_crp_kernel(up_ref, side_ref, ws_ref, bs_ref, wcrp_ref, o_ref, *,
                     H, W, num_stages, use_vpu):
    P = H * W
    up = up_ref[...].astype(jnp.float32)         # (Nb, C, P)  already conv_up+BN+ReLU6 (+resize)
    side_in = side_ref[...].astype(jnp.float32)  # (Nb, Cs, P) raw side input
    ws = ws_ref[...].astype(jnp.float32)         # (C, Cs)
    bs = bs_ref[...].astype(jnp.float32)         # (C, 1)

    side = jnp.clip(_conv1x1(ws, side_in, use_vpu) + bs[None, :, :], 0.0, 6.0)
    x = jnp.maximum(up + side, 0.0)              # relu(up + side)

    # Precompute the 8 one-dimensional validity masks once (separable 5x5 pool, pad = -inf).
    pos = lax.broadcasted_iota(jnp.int32, (1, 1, P), 2)
    row = pos // W
    col = pos % W
    NEG = jnp.float32(-3.0e38)
    v_taps = [((-dy * W) % P, (row + dy >= 0) & (row + dy < H)) for dy in (-2, -1, 1, 2)]
    h_taps = [((-dx) % P, (col + dx >= 0) & (col + dx < W)) for dx in (-2, -1, 1, 2)]

    acc = x
    cur = x
    for s in range(num_stages):
        # ---- separable 5x5 max pool, stride 1, padding 2 ----
        vmax = cur                                   # vertical pass (dy = -2..2)
        for shift, mask in v_taps:
            sh = pltpu.roll(cur, shift=shift, axis=2)
            vmax = jnp.maximum(vmax, jnp.where(mask, sh, NEG))
        pooled = vmax                                # horizontal pass (dx = -2..2)
        for shift, mask in h_taps:
            sh = pltpu.roll(vmax, shift=shift, axis=2)
            pooled = jnp.maximum(pooled, jnp.where(mask, sh, NEG))

        # ---- 1x1 conv (no bias) + chained residual accumulation ----
        conv = _conv1x1(wcrp_ref[s].astype(jnp.float32), pooled, use_vpu)
        acc = acc + conv
        cur = conv

    o_ref[...] = acc.astype(o_ref.dtype)


# ----------------------------------------------------------------------------
# Wrappers
# ----------------------------------------------------------------------------
def _pick_batch_block(n, per_image_bytes, target_bytes=1 << 20, min_blocks=2):
    """Pack images per block up to ~target bytes, keeping >=2 grid steps when possible."""
    nb = int(max(1, min(n, target_bytes // max(per_image_bytes, 1))))
    while nb > 1 and (n % nb != 0 or n // nb < min(min_blocks, n)):
        nb -= 1
    return nb


def _vmem_limit(block_bytes):
    # Double-buffered blocks + generous headroom; clamp to a budget safe on v5e/v6e/v7x.
    return int(min(max(8 * block_bytes, 16 << 20), 32 << 20))


def fold_bn(w, gamma, beta, mean, var, eps=1e-5):
    """Fold inference-mode BatchNorm into a bias-free 1x1 conv."""
    scale = gamma / jnp.sqrt(var + eps)
    return w * scale[:, None], beta - mean * scale


def conv_bn_relu6(x_nchw, w_folded, b_folded):
    n, ci, h, wdim = x_nchw.shape
    co = w_folded.shape[0]
    p = h * wdim
    x_flat = x_nchw.reshape(n, ci, p)            # lane-dense flatten done once in HBM layout
    use_vpu = max(ci, co) <= 32

    per_img = (ci + co) * p * 4
    nb = _pick_batch_block(n, per_img)
    block_bytes = nb * per_img + (co * ci + co) * 4

    y = pl.pallas_call(
        functools.partial(_convbn_relu6_kernel, use_vpu=use_vpu),
        out_shape=jax.ShapeDtypeStruct((n, co, p), jnp.float32),
        grid=(n // nb,),
        in_specs=[
            pl.BlockSpec((nb, ci, p), lambda i: (i, 0, 0)),
            pl.BlockSpec((co, ci), lambda i: (0, 0)),
            pl.BlockSpec((co, 1), lambda i: (0, 0)),
        ],
        out_specs=pl.BlockSpec((nb, co, p), lambda i: (i, 0, 0)),
        compiler_params=pltpu.CompilerParams(
            dimension_semantics=("parallel",),
            vmem_limit_bytes=_vmem_limit(block_bytes)),
    )(x_flat, w_folded, b_folded[:, None])
    return y.reshape(n, co, h, wdim)


def fuse_relu_crp(up_feat_nchw, side_nchw, w_side_f, b_side_f, w_crp):
    n, c, h, wdim = up_feat_nchw.shape
    cs = side_nchw.shape[1]
    stages = w_crp.shape[0]
    p = h * wdim
    up_flat = up_feat_nchw.reshape(n, c, p)
    side_flat = side_nchw.reshape(n, cs, p)
    use_vpu = max(c, cs) <= 32

    per_img = (2 * c + cs) * p * 4
    nb = _pick_batch_block(n, per_img)
    block_bytes = nb * per_img + (c * cs + c + stages * c * c) * 4

    out = pl.pallas_call(
        functools.partial(_fuse_crp_kernel, H=h, W=wdim,
                          num_stages=stages, use_vpu=use_vpu),
        out_shape=jax.ShapeDtypeStruct((n, c, p), jnp.float32),
        grid=(n // nb,),
        in_specs=[
            pl.BlockSpec((nb, c, p), lambda i: (i, 0, 0)),
            pl.BlockSpec((nb, cs, p), lambda i: (i, 0, 0)),
            pl.BlockSpec((c, cs), lambda i: (0, 0)),
            pl.BlockSpec((c, 1), lambda i: (0, 0)),
            pl.BlockSpec((stages, c, c), lambda i: (0, 0, 0)),
        ],
        out_specs=pl.BlockSpec((nb, c, p), lambda i: (i, 0, 0)),
        compiler_params=pltpu.CompilerParams(
            dimension_semantics=("parallel",),
            vmem_limit_bytes=_vmem_limit(block_bytes)),
    )(up_flat, side_flat, w_side_f, b_side_f[:, None], w_crp)
    return out.reshape(n, c, h, wdim)


def unet_block(side_input, up_input, params):
    """UnetBlock.forward(side_input, up_input) with inference-mode BatchNorm."""
    w_up_f, b_up_f = fold_bn(params["w_up"], params["gamma_up"], params["beta_up"],
                             params["mean_up"], params["var_up"])
    w_side_f, b_side_f = fold_bn(params["w_side"], params["gamma_side"], params["beta_side"],
                                 params["mean_side"], params["var_side"])

    up = conv_bn_relu6(up_input, w_up_f, b_up_f)
    if up.shape[-2:] != side_input.shape[-2:]:
        # TODO(synk): bilinear upsample (align_corners=False) done via jax.image.resize, not Pallas.
        n, c = up.shape[:2]
        up = jax.image.resize(up, (n, c) + side_input.shape[-2:], method="bilinear")
    return fuse_relu_crp(up, side_input, w_side_f, b_side_f, params["w_crp"])


# ----------------------------------------------------------------------------
# Pure-JAX reference (matches the PyTorch forward, inference-mode BN)
# ----------------------------------------------------------------------------
def _relu6(x):
    return jnp.clip(x, 0.0, 6.0)


def unet_block_reference(side_input, up_input, params):
    hp = jax.lax.Precision.HIGHEST
    w_up_f, b_up_f = fold_bn(params["w_up"], params["gamma_up"], params["beta_up"],
                             params["mean_up"], params["var_up"])
    w_side_f, b_side_f = fold_bn(params["w_side"], params["gamma_side"], params["beta_side"],
                                 params["mean_side"], params["var_side"])

    up = _relu6(jnp.einsum("oc,nchw->nohw", w_up_f, up_input, precision=hp)
                + b_up_f[None, :, None, None])
    side = _relu6(jnp.einsum("oc,nchw->nohw", w_side_f, side_input, precision=hp)
                  + b_side_f[None, :, None, None])
    if up.shape[-2:] != side.shape[-2:]:
        n, c = up.shape[:2]
        up = jax.image.resize(up, (n, c) + side.shape[-2:], method="bilinear")
    x = jnp.maximum(up + side, 0.0)

    acc = x
    cur = x
    for s in range(params["w_crp"].shape[0]):
        pooled = lax.reduce_window(
            cur, -jnp.inf, lax.max,
            window_dimensions=(1, 1, 5, 5),
            window_strides=(1, 1, 1, 1),
            padding=((0, 0), (0, 0), (2, 2), (2, 2)))
        conv = jnp.einsum("oc,nchw->nohw", params["w_crp"][s], pooled, precision=hp)
        acc = acc + conv
        cur = conv
    return acc


# ----------------------------------------------------------------------------
# Test
# ----------------------------------------------------------------------------
if __name__ == "__main__":
    key = jax.random.PRNGKey(0)
    keys = jax.random.split(key, 13)

    N = 2
    IN_UP, IN_SIDE, C = 8, 4, 4
    H, W = 16, 16          # side spatial
    HU, WU = 8, 8          # up spatial (differs -> exercises the bilinear-upsample branch)
    NUM_STAGES = 4         # UnetBlock default

    side_x = jax.random.normal(keys[0], (N, IN_SIDE, H, W), dtype=jnp.float32)
    up_x = jax.random.normal(keys[1], (N, IN_UP, HU, WU), dtype=jnp.float32)

    params = dict(
        w_up=jax.random.normal(keys[2], (C, IN_UP), dtype=jnp.float32) / jnp.sqrt(IN_UP),
        gamma_up=1.0 + 0.1 * jax.random.normal(keys[3], (C,), dtype=jnp.float32),
        beta_up=0.1 * jax.random.normal(keys[4], (C,), dtype=jnp.float32),
        mean_up=0.1 * jax.random.normal(keys[5], (C,), dtype=jnp.float32),
        var_up=jnp.abs(1.0 + 0.1 * jax.random.normal(keys[6], (C,), dtype=jnp.float32)),
        w_side=jax.random.normal(keys[7], (C, IN_SIDE), dtype=jnp.float32) / jnp.sqrt(IN_SIDE),
        gamma_side=1.0 + 0.1 * jax.random.normal(keys[8], (C,), dtype=jnp.float32),
        beta_side=0.1 * jax.random.normal(keys[9], (C,), dtype=jnp.float32),
        mean_side=0.1 * jax.random.normal(keys[10], (C,), dtype=jnp.float32),
        var_side=jnp.abs(1.0 + 0.1 * jax.random.normal(keys[11], (C,), dtype=jnp.float32)),
        w_crp=jax.random.normal(keys[12], (NUM_STAGES, C, C), dtype=jnp.float32) / jnp.sqrt(C),
    )

    out = jax.block_until_ready(unet_block(side_x, up_x, params))
    ref = jax.block_until_ready(unet_block_reference(side_x, up_x, params))

    if not jnp.allclose(out, ref, atol=1e-3, rtol=1e-3):
        raise AssertionError(
            f"mismatch vs reference: max abs err = {jnp.max(jnp.abs(out - ref))}")
    print("KERNEL_OK")
</pallas_src>

<mosaic_0001>
module attributes {stable_mosaic.version = 11 : i64} {
  func.func @_convbn_relu6_kernel(%arg0: i32, %arg1: memref<1x8x64xf32, #tpu.memory_space<vmem>>, %arg2: memref<4x8xf32, #tpu.memory_space<vmem>>, %arg3: memref<4x1xf32, #tpu.memory_space<vmem>>, %arg4: memref<1x4x64xf32, #tpu.memory_space<vmem>>) attributes {dimension_semantics = [#tpu.dimension_semantics<parallel>], iteration_bounds = array<i64: 2>, scalar_prefetch = 0 : i64, scratch_operands = 0 : i64, tpu.core_type = #tpu.core_type<tc>, window_params = [{transform_indices = @transform_0, window_bounds = array<i64: 1, 8, 64>}, {pipeline_mode = #tpu.pipeline_mode<synchronous>, transform_indices = @transform_1, window_bounds = array<i64: 4, 8>}, {pipeline_mode = #tpu.pipeline_mode<synchronous>, transform_indices = @transform_2, window_bounds = array<i64: 4, 1>}, {transform_indices = @transform_3, window_bounds = array<i64: 1, 4, 64>}]} {
    %c0 = arith.constant 0 : index
    %c0_0 = arith.constant 0 : index
    %c0_1 = arith.constant 0 : index
    %0 = vector.load %arg1[%c0, %c0_0, %c0_1] : memref<1x8x64xf32, #tpu.memory_space<vmem>>, vector<1x8x64xf32>
    %c0_2 = arith.constant 0 : index
    %c0_3 = arith.constant 0 : index
    %1 = vector.load %arg2[%c0_2, %c0_3] : memref<4x8xf32, #tpu.memory_space<vmem>>, vector<4x8xf32>
    %c0_4 = arith.constant 0 : index
    %c0_5 = arith.constant 0 : index
    %2 = vector.load %arg3[%c0_4, %c0_5] : memref<4x1xf32, #tpu.memory_space<vmem>>, vector<4x1xf32>
    %3 = vector.extract_strided_slice %1 {offsets = [0, 0], sizes = [4, 1], strides = [1, 1]} : vector<4x8xf32> to vector<4x1xf32>
    %4 = vector.shape_cast %3 : vector<4x1xf32> to vector<1x4x1xf32>
    %5 = vector.extract_strided_slice %0 {offsets = [0, 0, 0], sizes = [1, 1, 64], strides = [1, 1, 1]} : vector<1x8x64xf32> to vector<1x1x64xf32>
    %6 = vector.broadcast %4 : vector<1x4x1xf32> to vector<1x4x64xf32>
    %7 = vector.broadcast %5 : vector<1x1x64xf32> to vector<1x4x64xf32>
    %8 = arith.mulf %6, %7 : vector<1x4x64xf32>
    %9 = vector.extract_strided_slice %1 {offsets = [0, 1], sizes = [4, 1], strides = [1, 1]} : vector<4x8xf32> to vector<4x1xf32>
    %10 = vector.shape_cast %9 : vector<4x1xf32> to vector<1x4x1xf32>
    %11 = vector.extract_strided_slice %0 {offsets = [0, 1, 0], sizes = [1, 1, 64], strides = [1, 1, 1]} : vector<1x8x64xf32> to vector<1x1x64xf32>
    %12 = vector.broadcast %10 : vector<1x4x1xf32> to vector<1x4x64xf32>
    %13 = vector.broadcast %11 : vector<1x1x64xf32> to vector<1x4x64xf32>
    %14 = arith.mulf %12, %13 : vector<1x4x64xf32>
    %15 = arith.addf %8, %14 : vector<1x4x64xf32>
    %16 = vector.extract_strided_slice %1 {offsets = [0, 2], sizes = [4, 1], strides = [1, 1]} : vector<4x8xf32> to vector<4x1xf32>
    %17 = vector.shape_cast %16 : vector<4x1xf32> to vector<1x4x1xf32>
    %18 = vector.extract_strided_slice %0 {offsets = [0, 2, 0], sizes = [1, 1, 64], strides = [1, 1, 1]} : vector<1x8x64xf32> to vector<1x1x64xf32>
    %19 = vector.broadcast %17 : vector<1x4x1xf32> to vector<1x4x64xf32>
    %20 = vector.broadcast %18 : vector<1x1x64xf32> to vector<1x4x64xf32>
    %21 = arith.mulf %19, %20 : vector<1x4x64xf32>
    %22 = arith.addf %15, %21 : vector<1x4x64xf32>
    %23 = vector.extract_strided_slice %1 {offsets = [0, 3], sizes = [4, 1], strides = [1, 1]} : vector<4x8xf32> to vector<4x1xf32>
    %24 = vector.shape_cast %23 : vector<4x1xf32> to vector<1x4x1xf32>
    %25 = vector.extract_strided_slice %0 {offsets = [0, 3, 0], sizes = [1, 1, 64], strides = [1, 1, 1]} : vector<1x8x64xf32> to vector<1x1x64xf32>
    %26 = vector.broadcast %24 : vector<1x4x1xf32> to vector<1x4x64xf32>
    %27 = vector.broadcast %25 : vector<1x1x64xf32> to vector<1x4x64xf32>
    %28 = arith.mulf %26, %27 : vector<1x4x64xf32>
    %29 = arith.addf %22, %28 : vector<1x4x64xf32>
    %30 = vector.extract_strided_slice %1 {offsets = [0, 4], sizes = [4, 1], strides = [1, 1]} : vector<4x8xf32> to vector<4x1xf32>
    %31 = vector.shape_cast %30 : vector<4x1xf32> to vector<1x4x1xf32>
    %32 = vector.extract_strided_slice %0 {offsets = [0, 4, 0], sizes = [1, 1, 64], strides = [1, 1, 1]} : vector<1x8x64xf32> to vector<1x1x64xf32>
    %33 = vector.broadcast %31 : vector<1x4x1xf32> to vector<1x4x64xf32>
    %34 = vector.broadcast %32 : vector<1x1x64xf32> to vector<1x4x64xf32>
    %35 = arith.mulf %33, %34 : vector<1x4x64xf32>
    %36 = arith.addf %29, %35 : vector<1x4x64xf32>
    %37 = vector.extract_strided_slice %1 {offsets = [0, 5], sizes = [4, 1], strides = [1, 1]} : vector<4x8xf32> to vector<4x1xf32>
    %38 = vector.shape_cast %37 : vector<4x1xf32> to vector<1x4x1xf32>
    %39 = vector.extract_strided_slice %0 {offsets = [0, 5, 0], sizes = [1, 1, 64], strides = [1, 1, 1]} : vector<1x8x64xf32> to vector<1x1x64xf32>
    %40 = vector.broadcast %38 : vector<1x4x1xf32> to vector<1x4x64xf32>
    %41 = vector.broadcast %39 : vector<1x1x64xf32> to vector<1x4x64xf32>
    %42 = arith.mulf %40, %41 : vector<1x4x64xf32>
    %43 = arith.addf %36, %42 : vector<1x4x64xf32>
    %44 = vector.extract_strided_slice %1 {offsets = [0, 6], sizes = [4, 1], strides = [1, 1]} : vector<4x8xf32> to vector<4x1xf32>
    %45 = vector.shape_cast %44 : vector<4x1xf32> to vector<1x4x1xf32>
    %46 = vector.extract_strided_slice %0 {offsets = [0, 6, 0], sizes = [1, 1, 64], strides = [1, 1, 1]} : vector<1x8x64xf32> to vector<1x1x64xf32>
    %47 = vector.broadcast %45 : vector<1x4x1xf32> to vector<1x4x64xf32>
    %48 = vector.broadcast %46 : vector<1x1x64xf32> to vector<1x4x64xf32>
    %49 = arith.mulf %47, %48 : vector<1x4x64xf32>
    %50 = arith.addf %43, %49 : vector<1x4x64xf32>
    %51 = vector.extract_strided_slice %1 {offsets = [0, 7], sizes = [4, 1], strides = [1, 1]} : vector<4x8xf32> to vector<4x1xf32>
    %52 = vector.shape_cast %51 : vector<4x1xf32> to vector<1x4x1xf32>
    %53 = vector.extract_strided_slice %0 {offsets = [0, 7, 0], sizes = [1, 1, 64], strides = [1, 1, 1]} : vector<1x8x64xf32> to vector<1x1x64xf32>
    %54 = vector.broadcast %52 : vector<1x4x1xf32> to vector<1x4x64xf32>
    %55 = vector.broadcast %53 : vector<1x1x64xf32> to vector<1x4x64xf32>
    %56 = arith.mulf %54, %55 : vector<1x4x64xf32>
    %57 = arith.addf %50, %56 : vector<1x4x64xf32>
    %58 = vector.shape_cast %2 : vector<4x1xf32> to vector<1x4x1xf32>
    %59 = vector.broadcast %58 : vector<1x4x1xf32> to vector<1x4x64xf32>
    %60 = arith.addf %57, %59 : vector<1x4x64xf32>
    %cst = arith.constant 0.000000e+00 : f32
    %cst_6 = arith.constant 6.000000e+00 : f32
    %61 = vector.broadcast %cst : f32 to vector<1x4x64xf32>
    %62 = arith.maximumf %61, %60 : vector<1x4x64xf32>
    %63 = vector.broadcast %cst_6 : f32 to vector<1x4x64xf32>
    %64 = arith.minimumf %63, %62 : vector<1x4x64xf32>
    %c0_7 = arith.constant 0 : index
    %c0_8 = arith.constant 0 : index
    %c0_9 = arith.constant 0 : index
    %65 = vector.load %arg4[%c0_7, %c0_8, %c0_9] : memref<1x4x64xf32, #tpu.memory_space<vmem>>, vector<1x4x64xf32>
    tpu.vector_store %arg4[%c0_7, %c0_8, %c0_9], %64 {strides = array<i32>} : memref<1x4x64xf32, #tpu.memory_space<vmem>>, vector<1x4x64xf32>,
    return
  }
  func.func @transform_0(%arg0: i32) -> (i32, i32, i32) {
    %c0_i32 = arith.constant 0 : i32
    %c0_i32_0 = arith.constant 0 : i32
    %c0_i32_1 = arith.constant 0 : i32
    return %arg0, %c0_i32, %c0_i32_0 : i32, i32, i32
  }
  func.func @transform_1(%arg0: i32) -> (i32, i32) {
    %c0_i32 = arith.constant 0 : i32
    %c0_i32_0 = arith.constant 0 : i32
    %c0_i32_1 = arith.constant 0 : i32
    return %c0_i32, %c0_i32_0 : i32, i32
  }
  func.func @transform_2(%arg0: i32) -> (i32, i32) {
    %c0_i32 = arith.constant 0 : i32
    %c0_i32_0 = arith.constant 0 : i32
    %c0_i32_1 = arith.constant 0 : i32
    return %c0_i32, %c0_i32_0 : i32, i32
  }
  func.func @transform_3(%arg0: i32) -> (i32, i32, i32) {
    %c0_i32 = arith.constant 0 : i32
    %c0_i32_0 = arith.constant 0 : i32
    %c0_i32_1 = arith.constant 0 : i32
    return %arg0, %c0_i32, %c0_i32_0 : i32, i32, i32
  }
}

</mosaic_0001>

<bundles_post_ra>
// kernel: tpu_custom_call.1
= control target key start
LH: loop header
LB: loop body
LE: loop exit
PB: predicated region body
PF: predicated region fallthrough
CT: control target
= control target key end

     0   :  { %8 = vsyncpa [#allocation3], 0  ;;  %s737_s0 = inlined_call_operand.hbm [shape: f32[2,8,64], index: 0, kind: input, shape index: {}]   ;;  %s738_s1 = inlined_call_operand.vmem [shape: f32[4,8], index: 1, kind: input, shape index: {}]   ;;  %s739_s2 = inlined_call_operand.vmem [shape: f32[4,1], index: 2, kind: input, shape index: {}]   ;;  %s740_s3 = inlined_call_operand.hbm [shape: f32[2,4,64], index: 3, kind: output, shape index: {}]  }
   0x1   :  { %10 = vsyncpa [#allocation3 + $0x1], 0 }
   0x2   :  { %11 = vsyncpa [#allocation4], 0 }
   0x3   :  { %13 = vsyncpa [#allocation4 + $0x1], 0  ;;  %s566_s12 = smov 0   ;;  %s568_s13 = smov 0  }
   0x4   :  { %s570_s14 = smov 0   ;;  %s572_s15 = smov 0  }
   0x5 LB: > { %s587_s16 = sadd.s32 4294967295, %s534_s15   ;;  %s363_s17 = sadd.s32 4294967294, %s534_s15   ;;  %s534_s15 = sphi %s572_s15, %s755_s15   ;;  %s530_s14 = sphi %s570_s14, %s754_s14   ;;  %s526_s13 = sphi %s568_s13, %s753_s13   ;;  %s522_s12 = sphi %s566_s12, %s752_s12  }
   0x6   : > { %s591_s18 = sadd.s32 1, %s534_s15   ;;  %s26_s19 = sadd.s32 1, %s530_s14 }
   0x7   : > { %s23_s20 = ssub.s32 %s534_s15, %s591_s18  ;;  %p33_p0 = scmp.ne.s32.totalorder %s530_s14, %s526_s13 }
   0x8   : > { %p24_p1 = scmp.eq.s32.totalorder %s23_s20, 0  ;;  %p34_p2 = scmp.eq.s32.totalorder %s534_s15, 0 }
   0x9   : > { %p39_p3 = scmp.ne.s32.totalorder %s526_s13, %s522_s12  ;;  %p40_p4 = scmp.eq.s32.totalorder %s587_s16, 0 }
   0xa   : > { %s603_s21 = scalar_select %p24_p1, %s530_s14, %s26_s19  }
   0xb   : > { %p605_p5 = por %p34_p2, %p33_p0  ;;  %p609_p6 = por %p40_p4, %p39_p3 }
   0xc   : > { %p105_p7 = scmp.eq.s32.totalorder %s587_s16, 1  ;;  %p111_p8 = scmp.eq.s32.totalorder %s363_s17, 1 }
   0xd   : > { %p387_p10 = scmp.lt.s32.totalorder %s534_s15, 2  ;;  %s137_s26 = sand.u32 1, %s530_s14  }
   0xe   : > { %p616_p11 = por %p105_p7, %p33_p0  ;;  %p620_p12 = por %p111_p8, %p39_p3 }
   0xf   : > { %s367_s27 = sshll.u32 %s534_s15, 7  ;;  %s366_s28 = sshll.u32 %s137_s26, 3 }
  0x10   : > { %s744_s24 = scalar_select %p616_p11, 1, 0 }
  0x11   : > { %s745_s25 = scalar_select %p620_p12, 1, 0 }
  0x12   : > { %s629_s4 = scalar_lea.hbm %s737_s0, %s367_s27  ;;  %s141_s5 = scalar_lea.vmem [#allocation2], %s366_s28 }
  0x13   : > { %s148_s6 = sshll.u32 %s141_s5, 4  ;;  %p633_p13 = pnand %p387_p10, %p605_p5  ;;  %s637_s6 = int_to_ptr.vmem [resolvable:$true] %s148_s6 }
  0x14   : > { %s138_s8 = scalar_lea.sflag [#allocation3], %s137_s26  ;;  %s438_s9 = scalar_lea.hbm %s629_s4, 128 }
  0x15   : > { %p439_p2 = scmp.ne.s32.totalorder %s629_s4, %s438_s9  ;;  %p440_p3 = pneg %p633_p13 }
  0x16   : > { %s443_s17 = scalar_lea.hbm %s737_s0, 256  ;;  %p444_p5 = scmp.lt.u32.totalorder %s629_s4, %s737_s0 }
  0x17   : > { %p441_p4 = pnand %p440_p3, %p439_p2  ;;  %p445_p8 = scmp.lt.u32.totalorder %s443_s17, %s438_s9 }
  0x18   : > { %p447_p9 = scmp.lt.u32.totalorder %s438_s9, %s629_s4 }
  0x19   : > { %p442_p7 = pneg %p441_p4  ;;  %p446_p10 = por %p445_p8, %p444_p5 }
  0x1b   : > { %p448_p0 = por %p447_p9, %p446_p10 }
  0x1d   : > { %p449_p1 = pnand %p448_p0, %p442_p7 }
  0x1f   : > { %452 = shalt.err (!%p449_p1)
}
  0x20   : > { %s453_s22 = scalar_lea.vmem %s637_s6, 128  ;;  %s536_s26 = smov [#allocation2]  }
  0x21   : > { %p454_p2 = scmp.ne.s32.totalorder %s637_s6, %s453_s22  ;;  %s458_s27 = sshll.u32 %s536_s26, 4  ;;  %s459_s27 = int_to_ptr.vmem [resolvable:$false] %s458_s27 }
  0x22   : > { %s460_s28 = scalar_lea.vmem %s459_s27, 256  ;;  %p461_p11 = scmp.lt.s32.totalorder %s637_s6, %s459_s27 }
  0x23   : > { %p456_p4 = pnand %p454_p2, %p440_p3  ;;  %p462_p5 = scmp.lt.s32.totalorder %s460_s28, %s453_s22 }
  0x25   : > { %p457_p12 = pneg %p456_p4  ;;  %p463_p8 = por %p462_p5, %p461_p11 }
  0x27   : > { %p464_p9 = pnand %p463_p8, %p457_p12 }
  0x29   : > { %467 = shalt.err (!%p464_p9)
}
  0x2a   : > { %382 = dma.hbm_to_vmem [thread:$0]  (!%p633_p13), %s629_s4, 128, %s637_s6, %s138_s8  }
  0x2b   : > { %p747_p0 = scmp.lt.s32.totalorder %s534_s15, 3  ;;  %p748_p1 = scmp.ge.s32.totalorder %s534_s15, 1 }
  0x2d   : > { %p154_p3 = pnand %p748_p1, %p747_p0 }
  0x2e   : > { %s671_s29 = sand.u32 (!%p154_p3), 1, %s526_s13  }
  0x2f   : > { %157 = sbr.rel (%p154_p3) target bundleno = 229 (0xe5), region = 32  ;;  %s369_s30 = sshll.u32 (!%p154_p3), %s671_s29, 3 }
  0x30   : > { %s160_s5 = scalar_lea.sflag (!%p154_p3), [#allocation3], %s671_s29  ;;  %s675_s9 = scalar_lea.vmem (!%p154_p3), [#allocation2], %s369_s30 }
  0x36   : > { %513 = dma.done.wait (%p609_p6), %s160_s5, 128  }
  0x37   : > { %515 = vsyncadd (%p609_p6), %s160_s5, 4294967168  ;;  %v537_v0 = vmov 2   ;;  %v538_v1 = vmov 0   ;;  %v187_v2 = vld [vmem:[%s738_s1] sm:$0xf]  ;;  %v539_v3 = vmov 3   ;;  %v194_v10 = vlaneseq }
  0x38   : > { %431 = vset.pattern.permute.xlu1 %v537_v0  ;;  %429 = vset.pattern.permute.xlu0 %v538_v1  ;;  %v540_v4 = vmov 1   ;;  %v541_v5 = vmov 4   ;;  %v542_v6 = vmov 5   ;;  %v188_v7 = vld [vmem:[%s739_s2] sm:$0xf]  ;;  %v543_v8 = vmov 6  }
  0x39   : > { %210 = vperm.xlu1 %431, %v187_v2   ;;  %191 = vperm.xlu0 %429, %v187_v2   ;;  %v544_v9 = vmov 7   ;;  %v195_v11 = vshrl.u32 %v194_v10, 7  ;;  %v186_v17 = vld [vmem:[%s675_s9] sm:$0xff]  ;;  %s370_s8 = sshll.u32 %s671_s29, 2  ;;  %s372_s10 = sshll.u32 %s587_s16, 6  ;;  %vm277_vm0 = vcmask 519168  }
  0x3a   : > { %s185_s11 = scalar_lea.vmem [#allocation5], %s370_s8  ;;  %s693_s22 = scalar_lea.hbm %s740_s3, %s372_s10 }
  0x3b   : > { %v196_v12 = vsub.s32 0, %v195_v11  ;;  %v205_v13 = vsub.s32 1, %v195_v11  ;;  %v215_v14 = vsub.s32 2, %v195_v11  ;;  %v225_v19 = vsub.s32 3, %v195_v11  ;;  %s293_s17 = sshll.u32 %s185_s11, 4  ;;  %s280_s26 = scalar_lea.sflag [#allocation4], %s671_s29  ;;  %s695_s17 = int_to_ptr.vmem [resolvable:$true] %s293_s17 }
  0x3c   : > { %v235_v21 = vsub.s32 4, %v195_v11  ;;  %v245_v25 = vsub.s32 5, %v195_v11  ;;  %v255_v33 = vsub.s32 6, %v195_v11  ;;  %v265_v42 = vsub.s32 7, %v195_v11  ;;  %s468_s27 = scalar_lea.vmem %s695_s17, 64  ;;  %p749_p11 = scmp.ne.s32.totalorder %s744_s24, 0 }
  0x3d   : > { %432 = vset.pattern.permute.xlu1 %v539_v3  ;;  %430 = vset.pattern.permute.xlu0 %v540_v4  ;;  %v197_v18 = vrot.slane %v186_v17, %v196_v12  ;;  %v206_v20 = vrot.slane %v186_v17, %v205_v13  ;;  %v216_v22 = vrot.slane %v186_v17, %v215_v14  ;;  %p469_p6 = scmp.ne.s32.totalorder %s695_s17, %s468_s27  ;;  %s545_s16 = smov [#allocation5]  }
  0x3e   : > { %220 = vperm.xlu1 %432, %v187_v2   ;;  %200 = vperm.xlu0 %430, %v187_v2   ;;  %v226_v27 = vrot.slane %v186_v17, %v225_v19  ;;  %v236_v29 = vrot.slane %v186_v17, %v235_v21  ;;  %v246_v32 = vrot.slane %v186_v17, %v245_v25  ;;  %s472_s28 = sshll.u32 %s545_s16, 4  ;;  %s473_s28 = int_to_ptr.vmem [resolvable:$false] %s472_s28 }
  0x3f   : > { %v256_v41 = vrot.slane %v186_v17, %v255_v33  ;;  %v266_v47 = vrot.slane %v186_v17, %v265_v42  ;;  %p470_p12 = pnand %p469_p6, %p749_p11  ;;  %s474_s30 = scalar_lea.vmem %s473_s28, 128 }
  0x40   : > { %p475_p7 = scmp.lt.s32.totalorder %s695_s17, %s473_s28  ;;  %p476_p10 = scmp.lt.s32.totalorder %s474_s30, %s468_s27 }
  0x41   : > { %p471_p13 = pneg %p470_p12 }
  0x42   : > { %433 = vset.pattern.permute.xlu1 %v541_v5  ;;  %434 = vset.pattern.permute.xlu0 %v542_v6  ;;  %p477_p2 = por %p476_p10, %p475_p7 }
  0x43   : > { %230 = vperm.xlu1 %433, %v187_v2   ;;  %240 = vperm.xlu0 %434, %v187_v2  }
  0x44   : > { %p478_p4 = pnand %p477_p2, %p471_p13 }
  0x47   : > { %435 = vset.pattern.permute.xlu1 %v543_v8  ;;  %437 = vset.pattern.permute.xlu0 %v538_v1 }
  0x48   : > { %250 = vperm.xlu1 %435, %v187_v2   ;;  %271 = vperm.xlu0 %437, %v188_v7  }
  0x4c   : > { %436 = vset.pattern.permute.xlu1 %v544_v9 }
  0x4d   : > { %260 = vperm.xlu1 %436, %v187_v2  }
  0xb8   : > { %v211_v15 = vpop.permute.xlu1 %210  ;;  %v192_v16 = vpop.permute.xlu0 %191 }
  0xb9   : > { %v198_v26 = vmul.f32 %v197_v18, %v192_v16  ;;  %v217_v30 = vmul.f32 %v216_v22, %v211_v15 }
  0xbd   : > { %v221_v23 = vpop.permute.xlu1 %220  ;;  %v201_v24 = vpop.permute.xlu0 %200 }
  0xbe   : > { %v207_v28 = vmul.f32 %v206_v20, %v201_v24  ;;  %v227_v34 = vmul.f32 %v226_v27, %v221_v23 }
  0xc0   : > { %v208_v31 = vadd.f32 %v207_v28, %v198_v26 }
  0xc2   : > { %v218_v35 = vadd.f32 %v217_v30, %v208_v31  ;;  %v231_v36 = vpop.permute.xlu1 %230  ;;  %v241_v37 = vpop.permute.xlu0 %240 }
  0xc3   : > { %v237_v38 = vmul.f32 %v236_v29, %v231_v36  ;;  %v247_v40 = vmul.f32 %v246_v32, %v241_v37 }
  0xc4   : > { %v228_v39 = vadd.f32 %v227_v34, %v218_v35 }
  0xc6   : > { %v238_v43 = vadd.f32 %v237_v38, %v228_v39 }
  0xc7   : > { %v251_v44 = vpop.permute.xlu1 %250  ;;  %v272_v51 = vpop.permute.xlu0 %271 }
  0xc8   : > { %v248_v45 = vadd.f32 %v247_v40, %v238_v43  ;;  %v257_v46 = vmul.f32 %v256_v41, %v251_v44 }
  0xca   : > { %v258_v49 = vadd.f32 %v257_v46, %v248_v45 }
  0xcc   : > { %v261_v48 = vpop.permute.xlu1 %260 }
  0xcd   : > { %v267_v50 = vmul.f32 %v266_v47, %v261_v48 }
  0xcf   : > { %v268_v52 = vadd.f32 %v267_v50, %v258_v49 }
  0xd1   : > { %v274_v53 = vadd.f32 %v272_v51, %v268_v52 }
  0xd3   : > { %v275_v54 = vmax.f32 %v274_v53, 0.0 }
  0xd5   : > { %v276_v55 = vmin.f32 %v275_v54, 6.0 }
  0xd7   : > { %278 = vst.msk [vmem:[%s185_s11] sm:$0xf] %vm277_vm0, %v276_v55 }
  0xd8   : > { %481 = shalt.err (!%p478_p4)
}
  0xd9   : > { %s482_s29 = scalar_lea.hbm %s693_s22, 64  ;;  %s486_s4 = scalar_lea.hbm %s740_s3, 128 }
  0xda   : > { %p483_p5 = scmp.ne.s32.totalorder %s693_s22, %s482_s29  ;;  %p487_p0 = scmp.lt.u32.totalorder %s693_s22, %s740_s3 }
  0xdb   : > { %p488_p1 = scmp.lt.u32.totalorder %s486_s4, %s482_s29  ;;  %p490_p6 = scmp.lt.u32.totalorder %s482_s29, %s693_s22 }
  0xdc   : > { %p484_p8 = pnand %p483_p5, %p749_p11 }
  0xdd   : > { %p489_p3 = por %p488_p1, %p487_p0 }
  0xde   : > { %p485_p9 = pneg %p484_p8 }
  0xdf   : > { %p491_p12 = por %p490_p6, %p489_p3 }
  0xe1   : > { %p492_p13 = pnand %p491_p12, %p485_p9 }
  0xe3   : > { %495 = shalt.err (!%p492_p13)
}
  0xe4   : > { %377 = dma.vmem_to_hbm [thread:$0]  (%p749_p11), %s695_s17, 64, %s693_s22, %s280_s26  }
  0xe5 PF: > { %s305_s7 = sand.u32 1, %s522_s12   ;;  %p750_p7 = scmp.ne.s32.totalorder %s745_s25, 0 }
  0xe6   : > { %p751_p10 = scmp.ge.s32.totalorder %s534_s15, 2  ;;  %s306_s8 = scalar_lea.sflag [#allocation4], %s305_s7 }
  0xe8   : > { %p384_p2 = pnand %p751_p10, %p750_p7 }
  0xea   : > { %517 = dma.done.wait (!%p384_p2), %s306_s8, 64  }
  0xeb   : > { %519 = vsyncadd (!%p384_p2), %s306_s8, 4294967232  ;;  %p16_p4 = scmp.ge.s32.totalorder %s591_s18, 4   ;;  %s752_s12 = smov %s526_s13 }
  0xec   : > { %s753_s13 = smov %s530_s14  ;;  %s754_s14 = smov %s603_s21 }
  0xed   : > { %s755_s15 = smov %s591_s18  ;;  %18 = sbr.rel (!%p16_p4) target bundleno = 5 (0x5), region = 77 }
  0xf4   :  { %311 = vsyncpa [#allocation3], 1 }
  0xf5   :  { %313 = vsyncpa [#allocation3 + $0x1], 1 }
  0xf6   :  { %314 = vsyncpa [#allocation4], 1 }
  0xf7   :  { %316 = vsyncpa [#allocation4 + $0x1], 1 }

</bundles_post_ra>
